<compile_context>
chip_gen: v5e
topology: v5e:2x2
jax: 0.10.0
libtpu: 0.0.40
codegen_flags: <defaults>
</compile_context>

<pallas_src>
import jax
import jax.numpy as jnp
from jax.experimental import pallas as pl
from jax.experimental.pallas import tpu as pltpu

LATENT_DIM = 128
H1 = 64
H2 = 128
PARAM_OUT = 3  # Rp, Rd, C


# ----------------------------------------------------------------------------
# Kernel
# ----------------------------------------------------------------------------
def latent_ode_kernel(z_ref, w1_ref, b1_ref, w2_ref, b2_ref, w3_ref, b3_ref,
                      out_ref):
    z = z_ref[...].astype(jnp.float32)                                  # (TB, 128)

    # fused layer 1: [param | comp] first layers, K=128
    h1 = jnp.dot(z, w1_ref[...], preferred_element_type=jnp.float32) + b1_ref[...]
    h1 = jnp.maximum(h1, 0.0)                                           # (TB, 128)

    # fused layer 2: block-diagonal, K=128
    h2 = jnp.dot(h1, w2_ref[...], preferred_element_type=jnp.float32) + b2_ref[...]
    h2 = jnp.maximum(h2, 0.0)                                           # (TB, 256)

    # fused layer 3: block-diagonal, K=256
    y3 = jnp.dot(h2, w3_ref[...], preferred_element_type=jnp.float32) + b3_ref[...]
    # y3 lanes: [0]=p0, [1]=-p1, [2]=-p2 (cols 1,2 pre-negated at pack time),
    #           [3:128]=0 (padding), [128:256]=comp

    # single full-width EUP exp; padded lanes give exp(0)=1 and are never used
    e = jnp.exp(y3[:, :LATENT_DIM])                                     # (TB, 128)
    Rp = e[:, 0:1]        # exp(p0)
    inv_Rd = e[:, 1:2]    # exp(-p1) = 1/Rd
    inv_C = e[:, 2:3]     # exp(-p2) = 1/C
    comp = y3[:, LATENT_DIM:]                                           # (TB, 128)

    # dz/dt = (-z/Rd - Rp*z + comp)/C  ==  (comp - z*(Rp + 1/Rd)) * (1/C)
    dzdt = (comp - z * (Rp + inv_Rd)) * inv_C
    out_ref[...] = dzdt.astype(out_ref.dtype)


# ----------------------------------------------------------------------------
# Parameter init (raw, torch-Linear-like, stored as (in, out)) and packing
# ----------------------------------------------------------------------------
def init_params(key, latent_dim=LATENT_DIM):
    def linear(key, fan_in, fan_out):
        kw, kb = jax.random.split(key)
        bound = 1.0 / jnp.sqrt(fan_in)
        w = jax.random.uniform(kw, (fan_in, fan_out), jnp.float32, -bound, bound)
        b = jax.random.uniform(kb, (1, fan_out), jnp.float32, -bound, bound)
        return w, b

    keys = jax.random.split(key, 6)
    w1p, b1p = linear(keys[0], latent_dim, H1)
    w2p, b2p = linear(keys[1], H1, H2)
    w3p, b3p = linear(keys[2], H2, PARAM_OUT)
    w1c, b1c = linear(keys[3], latent_dim, H1)
    w2c, b2c = linear(keys[4], H1, H2)
    w3c, b3c = linear(keys[5], H2, latent_dim)
    return (w1p, b1p, w2p, b2p, w3p, b3p, w1c, b1c, w2c, b2c, w3c, b3c)


def pack_params(raw):
    """Pack the two MLPs into 3 fused (block-diagonal) weight matrices."""
    (w1p, b1p, w2p, b2p, w3p, b3p, w1c, b1c, w2c, b2c, w3c, b3c) = raw

    # layer 1: side-by-side
    W1 = jnp.concatenate([w1p, w1c], axis=1)                      # (128, 128)
    b1 = jnp.concatenate([b1p, b1c], axis=1)                      # (1, 128)

    # layer 2: block-diagonal
    W2 = jnp.zeros((2 * H1, 2 * H2), jnp.float32)
    W2 = W2.at[:H1, :H2].set(w2p).at[H1:, H2:].set(w2c)           # (128, 256)
    b2 = jnp.concatenate([b2p, b2c], axis=1)                      # (1, 256)

    # layer 3: block-diagonal; param head padded to 128 lanes, columns 1,2
    # negated so exp() of the output directly yields 1/Rd and 1/C.
    sign = jnp.array([[1.0, -1.0, -1.0]], jnp.float32)            # (1, 3)
    w3p_pad = jnp.zeros((H2, LATENT_DIM), jnp.float32).at[:, :PARAM_OUT].set(w3p * sign)
    b3p_pad = jnp.zeros((1, LATENT_DIM), jnp.float32).at[:, :PARAM_OUT].set(b3p * sign)
    W3 = jnp.zeros((2 * H2, 2 * LATENT_DIM), jnp.float32)
    W3 = W3.at[:H2, :LATENT_DIM].set(w3p_pad).at[H2:, LATENT_DIM:].set(w3c)  # (256, 256)
    b3 = jnp.concatenate([b3p_pad, b3c], axis=1)                  # (1, 256)

    return (W1, b1, W2, b2, W3, b3)


# ----------------------------------------------------------------------------
# Wrapper
# ----------------------------------------------------------------------------
def latent_ode_func(t, z, packed, *, tb=256):
    """dz/dt = LatentODEFunc.forward(t, z).  `packed` from pack_params()."""
    del t  # unused in the reference forward (kept for ODE-solver signature)
    B, D = z.shape
    assert D == LATENT_DIM
    W1, b1, W2, b2, W3, b3 = packed

    # batch tile: multiple of 8 sublanes, capped at `tb`; pad B up if needed
    b8 = max(8, ((B + 7) // 8) * 8)
    TB = min(tb, b8)
    Bp = ((b8 + TB - 1) // TB) * TB
    z_in = z if Bp == B else jnp.zeros((Bp, D), z.dtype).at[:B].set(z)

    const2d = lambda arr: pl.BlockSpec(arr.shape, lambda i: (0, 0))

    out = pl.pallas_call(
        latent_ode_kernel,
        out_shape=jax.ShapeDtypeStruct((Bp, D), z.dtype),
        grid=(Bp // TB,),
        in_specs=[
            pl.BlockSpec((TB, D), lambda i: (i, 0)),   # z: tiled over batch
            const2d(W1), const2d(b1),                  # weights: resident (constant
            const2d(W2), const2d(b2),                  # index_map -> DMA'd once)
            const2d(W3), const2d(b3),
        ],
        out_specs=pl.BlockSpec((TB, D), lambda i: (i, 0)),
        compiler_params=pltpu.CompilerParams(
            dimension_semantics=("parallel",)),
    )(z_in, W1, b1, W2, b2, W3, b3)

    return out if Bp == B else out[:B]


# ----------------------------------------------------------------------------
# Pure-JAX reference of the PyTorch forward (unfused weights)
# ----------------------------------------------------------------------------
def latent_ode_func_ref(t, z, raw):
    del t
    (w1p, b1p, w2p, b2p, w3p, b3p, w1c, b1c, w2c, b2c, w3c, b3c) = raw
    h = jnp.maximum(z @ w1p + b1p, 0.0)
    h = jnp.maximum(h @ w2p + b2p, 0.0)
    p = h @ w3p + b3p
    Rp = jnp.exp(p[:, 0:1])
    Rd = jnp.exp(p[:, 1:2])
    C = jnp.exp(p[:, 2:3])
    g = jnp.maximum(z @ w1c + b1c, 0.0)
    g = jnp.maximum(g @ w2c + b2c, 0.0)
    comp = g @ w3c + b3c
    return (-z / Rd - Rp * z + comp) / C


if __name__ == "__main__":
    key = jax.random.PRNGKey(0)
    kp, kz1, kz2 = jax.random.split(key, 3)
    raw = init_params(kp)
    packed = pack_params(raw)
    t = jnp.float32(0.0)

    # small example (single tile)
    B = 8
    z = jax.random.normal(kz1, (B, LATENT_DIM), jnp.float32) * 0.1
    out = jax.block_until_ready(latent_ode_func(t, z, packed))
    ref = latent_ode_func_ref(t, z, raw)
    assert out.shape == (B, LATENT_DIM)
    assert jnp.allclose(out, ref, atol=1e-4, rtol=1e-4), "mismatch vs reference (B=8)"

    # exercise the batch grid + padding path (multiple tiles, ragged batch)
    B2 = 300
    z2 = jax.random.normal(kz2, (B2, LATENT_DIM), jnp.float32) * 0.1
    out2 = jax.block_until_ready(latent_ode_func(t, z2, packed))
    ref2 = latent_ode_func_ref(t, z2, raw)
    assert out2.shape == (B2, LATENT_DIM)
    assert jnp.allclose(out2, ref2, atol=1e-4, rtol=1e-4), "mismatch vs reference (B=300)"

    print("KERNEL_OK")
</pallas_src>

<mosaic_0001>
module attributes {stable_mosaic.version = 11 : i64} {
  func.func @latent_ode_kernel(%arg0: i32, %arg1: memref<8x128xf32, #tpu.memory_space<vmem>>, %arg2: memref<128x128xf32, #tpu.memory_space<vmem>>, %arg3: memref<1x128xf32, #tpu.memory_space<vmem>>, %arg4: memref<128x256xf32, #tpu.memory_space<vmem>>, %arg5: memref<1x256xf32, #tpu.memory_space<vmem>>, %arg6: memref<256x256xf32, #tpu.memory_space<vmem>>, %arg7: memref<1x256xf32, #tpu.memory_space<vmem>>, %arg8: memref<8x128xf32, #tpu.memory_space<vmem>>) attributes {dimension_semantics = [#tpu.dimension_semantics<parallel>], iteration_bounds = array<i64: 1>, scalar_prefetch = 0 : i64, scratch_operands = 0 : i64, tpu.core_type = #tpu.core_type<tc>, window_params = [{transform_indices = @transform_0, window_bounds = array<i64: 8, 128>}, {pipeline_mode = #tpu.pipeline_mode<synchronous>, transform_indices = @transform_1, window_bounds = array<i64: 128, 128>}, {pipeline_mode = #tpu.pipeline_mode<synchronous>, transform_indices = @transform_2, window_bounds = array<i64: 1, 128>}, {pipeline_mode = #tpu.pipeline_mode<synchronous>, transform_indices = @transform_3, window_bounds = array<i64: 128, 256>}, {pipeline_mode = #tpu.pipeline_mode<synchronous>, transform_indices = @transform_4, window_bounds = array<i64: 1, 256>}, {pipeline_mode = #tpu.pipeline_mode<synchronous>, transform_indices = @transform_5, window_bounds = array<i64: 256, 256>}, {pipeline_mode = #tpu.pipeline_mode<synchronous>, transform_indices = @transform_6, window_bounds = array<i64: 1, 256>}, {transform_indices = @transform_7, window_bounds = array<i64: 8, 128>}]} {
    %c0 = arith.constant 0 : index
    %c0_0 = arith.constant 0 : index
    %0 = vector.load %arg1[%c0, %c0_0] : memref<8x128xf32, #tpu.memory_space<vmem>>, vector<8x128xf32>
    %c0_1 = arith.constant 0 : index
    %c0_2 = arith.constant 0 : index
    %1 = vector.load %arg2[%c0_1, %c0_2] : memref<128x128xf32, #tpu.memory_space<vmem>>, vector<128x128xf32>
    %cst = arith.constant dense<0.000000e+00> : vector<8x128xf32>
    %2 = tpu.matmul %0, %1, %cst {dimension_numbers = #tpu.dot_dimension_numbers<[1], [0], [0], [1], [0, 0, 1, 1], [], []>} : vector<8x128xf32>, vector<128x128xf32>, vector<8x128xf32> -> vector<8x128xf32>
    %c0_3 = arith.constant 0 : index
    %c0_4 = arith.constant 0 : index
    %3 = vector.load %arg3[%c0_3, %c0_4] : memref<1x128xf32, #tpu.memory_space<vmem>>, vector<1x128xf32>
    %4 = vector.broadcast %3 : vector<1x128xf32> to vector<8x128xf32>
    %5 = arith.addf %2, %4 : vector<8x128xf32>
    %cst_5 = arith.constant 0.000000e+00 : f32
    %6 = vector.broadcast %cst_5 : f32 to vector<8x128xf32>
    %7 = arith.maximumf %5, %6 : vector<8x128xf32>
    %c0_6 = arith.constant 0 : index
    %c0_7 = arith.constant 0 : index
    %8 = vector.load %arg4[%c0_6, %c0_7] : memref<128x256xf32, #tpu.memory_space<vmem>>, vector<128x256xf32>
    %cst_8 = arith.constant dense<0.000000e+00> : vector<8x256xf32>
    %9 = tpu.matmul %7, %8, %cst_8 {dimension_numbers = #tpu.dot_dimension_numbers<[1], [0], [0], [1], [0, 0, 1, 1], [], []>} : vector<8x128xf32>, vector<128x256xf32>, vector<8x256xf32> -> vector<8x256xf32>
    %c0_9 = arith.constant 0 : index
    %c0_10 = arith.constant 0 : index
    %10 = vector.load %arg5[%c0_9, %c0_10] : memref<1x256xf32, #tpu.memory_space<vmem>>, vector<1x256xf32>
    %11 = vector.broadcast %10 : vector<1x256xf32> to vector<8x256xf32>
    %12 = arith.addf %9, %11 : vector<8x256xf32>
    %cst_11 = arith.constant 0.000000e+00 : f32
    %13 = vector.broadcast %cst_11 : f32 to vector<8x256xf32>
    %14 = arith.maximumf %12, %13 : vector<8x256xf32>
    %c0_12 = arith.constant 0 : index
    %c0_13 = arith.constant 0 : index
    %15 = vector.load %arg6[%c0_12, %c0_13] : memref<256x256xf32, #tpu.memory_space<vmem>>, vector<256x256xf32>
    %cst_14 = arith.constant dense<0.000000e+00> : vector<8x256xf32>
    %16 = tpu.matmul %14, %15, %cst_14 {dimension_numbers = #tpu.dot_dimension_numbers<[1], [0], [0], [1], [0, 0, 1, 1], [], []>} : vector<8x256xf32>, vector<256x256xf32>, vector<8x256xf32> -> vector<8x256xf32>
    %c0_15 = arith.constant 0 : index
    %c0_16 = arith.constant 0 : index
    %17 = vector.load %arg7[%c0_15, %c0_16] : memref<1x256xf32, #tpu.memory_space<vmem>>, vector<1x256xf32>
    %18 = vector.broadcast %17 : vector<1x256xf32> to vector<8x256xf32>
    %19 = arith.addf %16, %18 : vector<8x256xf32>
    %20 = vector.extract_strided_slice %19 {offsets = [0, 0], sizes = [8, 128], strides = [1, 1]} : vector<8x256xf32> to vector<8x128xf32>
    %21 = math.exp %20 : vector<8x128xf32>
    %22 = vector.extract_strided_slice %21 {offsets = [0, 0], sizes = [8, 1], strides = [1, 1]} : vector<8x128xf32> to vector<8x1xf32>
    %23 = vector.extract_strided_slice %21 {offsets = [0, 1], sizes = [8, 1], strides = [1, 1]} : vector<8x128xf32> to vector<8x1xf32>
    %24 = vector.extract_strided_slice %21 {offsets = [0, 2], sizes = [8, 1], strides = [1, 1]} : vector<8x128xf32> to vector<8x1xf32>
    %25 = vector.extract_strided_slice %19 {offsets = [0, 128], sizes = [8, 128], strides = [1, 1]} : vector<8x256xf32> to vector<8x128xf32>
    %26 = arith.addf %22, %23 : vector<8x1xf32>
    %27 = vector.broadcast %26 : vector<8x1xf32> to vector<8x128xf32>
    %28 = arith.mulf %0, %27 : vector<8x128xf32>
    %29 = arith.subf %25, %28 : vector<8x128xf32>
    %30 = vector.broadcast %24 : vector<8x1xf32> to vector<8x128xf32>
    %31 = arith.mulf %29, %30 : vector<8x128xf32>
    %c0_17 = arith.constant 0 : index
    %c0_18 = arith.constant 0 : index
    %32 = vector.load %arg8[%c0_17, %c0_18] : memref<8x128xf32, #tpu.memory_space<vmem>>, vector<8x128xf32>
    tpu.vector_store %arg8[%c0_17, %c0_18], %31 {strides = array<i32>} : memref<8x128xf32, #tpu.memory_space<vmem>>, vector<8x128xf32>,
    return
  }
  func.func @transform_0(%arg0: i32) -> (i32, i32) {
    %c0_i32 = arith.constant 0 : i32
    %c0_i32_0 = arith.constant 0 : i32
    return %arg0, %c0_i32 : i32, i32
  }
  func.func @transform_1(%arg0: i32) -> (i32, i32) {
    %c0_i32 = arith.constant 0 : i32
    %c0_i32_0 = arith.constant 0 : i32
    %c0_i32_1 = arith.constant 0 : i32
    return %c0_i32, %c0_i32_0 : i32, i32
  }
  func.func @transform_2(%arg0: i32) -> (i32, i32) {
    %c0_i32 = arith.constant 0 : i32
    %c0_i32_0 = arith.constant 0 : i32
    %c0_i32_1 = arith.constant 0 : i32
    return %c0_i32, %c0_i32_0 : i32, i32
  }
  func.func @transform_3(%arg0: i32) -> (i32, i32) {
    %c0_i32 = arith.constant 0 : i32
    %c0_i32_0 = arith.constant 0 : i32
    %c0_i32_1 = arith.constant 0 : i32
    return %c0_i32, %c0_i32_0 : i32, i32
  }
  func.func @transform_4(%arg0: i32) -> (i32, i32) {
    %c0_i32 = arith.constant 0 : i32
    %c0_i32_0 = arith.constant 0 : i32
    %c0_i32_1 = arith.constant 0 : i32
    return %c0_i32, %c0_i32_0 : i32, i32
  }
  func.func @transform_5(%arg0: i32) -> (i32, i32) {
    %c0_i32 = arith.constant 0 : i32
    %c0_i32_0 = arith.constant 0 : i32
    %c0_i32_1 = arith.constant 0 : i32
    return %c0_i32, %c0_i32_0 : i32, i32
  }
  func.func @transform_6(%arg0: i32) -> (i32, i32) {
    %c0_i32 = arith.constant 0 : i32
    %c0_i32_0 = arith.constant 0 : i32
    %c0_i32_1 = arith.constant 0 : i32
    return %c0_i32, %c0_i32_0 : i32, i32
  }
  func.func @transform_7(%arg0: i32) -> (i32, i32) {
    %c0_i32 = arith.constant 0 : i32
    %c0_i32_0 = arith.constant 0 : i32
    return %arg0, %c0_i32 : i32, i32
  }
}

</mosaic_0001>

<bundles_post_ra>
// kernel: tpu_custom_call.1
= control target key start
LH: loop header
LB: loop body
LE: loop exit
PB: predicated region body
PF: predicated region fallthrough
CT: control target
= control target key end

     0   :  { %12 = vsyncpa [#allocation3], 0  ;;  %s664_s0 = inlined_call_operand.hbm [shape: f32[8,128], index: 0, kind: input, shape index: {}]   ;;  %s665_s1 = inlined_call_operand.hbm [shape: f32[128,128], index: 1, kind: input, shape index: {}]   ;;  %s666_s2 = inlined_call_operand.hbm [shape: f32[1,128], index: 2, kind: input, shape index: {}]   ;;  %s667_s3 = inlined_call_operand.hbm [shape: f32[128,256], index: 3, kind: input, shape index: {}]   ;;  %s668_s4 = inlined_call_operand.vmem [shape: f32[1,256], index: 4, kind: input, shape index: {}]   ;;  %s669_s5 = inlined_call_operand.hbm [shape: f32[256,256], index: 5, kind: input, shape index: {}]   ;;  %s670_s6 = inlined_call_operand.vmem [shape: f32[1,256], index: 6, kind: input, shape index: {}]   ;;  %s671_s7 = inlined_call_operand.hbm [shape: f32[8,128], index: 7, kind: output, shape index: {}]  }
   0x1   :  { %13 = vsyncpa [#allocation6], 0 }
   0x2   :  { %14 = vsyncpa [#allocation9], 0  ;;  %s31_s26 = sshll.u32 %s665_s1, 4  ;;  %s32_s26 = int_to_ptr.hbm [resolvable:$true] %s31_s26 }
   0x3   :  { %15 = vsyncpa [#allocation4], 0  ;;  %s583_s27 = smov [#allocation5]   ;;  %s55_s8 = sshll.u32 %s667_s3, 4  ;;  %s56_s8 = int_to_ptr.hbm [resolvable:$true] %s55_s8 }
   0x4   :  { %s33_s28 = sshll.u32 %s583_s27, 4  ;;  %s584_s9 = smov 128   ;;  %s34_s28 = int_to_ptr.vmem [resolvable:$true] %s33_s28 }
   0x5   :  { %s585_s10 = smov 8   ;;  %s586_s11 = smov [#allocation8]  }
   0x6   :  { %39 = dma.hbm_to_vmem [thread:$0]  %s32_s26, 2048, %s34_s28, [#allocation6], %s584_s9, %s584_s9, %s585_s10  }
   0x7   :  { %s57_s12 = sshll.u32 %s586_s11, 4  ;;  %s587_s13 = smov 256   ;;  %s58_s12 = int_to_ptr.vmem [resolvable:$true] %s57_s12 }
   0x8   :  { %s588_s14 = smov 16   ;;  %s21_s16 = sshll.u32 %s664_s0, 4  ;;  %s22_s16 = int_to_ptr.hbm [resolvable:$true] %s21_s16 }
   0x9   :  { %63 = dma.hbm_to_vmem [thread:$0]  %s56_s8, 4096, %s58_s12, [#allocation9], %s587_s13, %s587_s13, %s588_s14  }
   0xa   :  { %s589_s17 = smov [#allocation2]   ;;  %s45_s20 = sshll.u32 %s666_s2, 4  ;;  %s46_s20 = int_to_ptr.hbm [resolvable:$true] %s45_s20 }
   0xb   :  { %s23_s18 = sshll.u32 %s589_s17, 4  ;;  %s590_s21 = smov [#allocation7]   ;;  %s24_s18 = int_to_ptr.vmem [resolvable:$true] %s23_s18 }
   0xc   :  { %26 = dma.hbm_to_vmem [thread:$0]  %s22_s16, 128, %s24_s18, [#allocation3]  }
   0xd   :  { %s47_s22 = sshll.u32 %s590_s21, 4  ;;  %s70_s25 = sshll.u32 %s669_s5, 4  ;;  %s48_s22 = int_to_ptr.vmem [resolvable:$true] %s47_s22  ;;  %s71_s25 = int_to_ptr.hbm [resolvable:$true] %s70_s25 }
   0xe   :  { %50 = dma.hbm_to_vmem [thread:$0]  %s46_s20, 16, %s48_s22, [#allocation6]  }
   0xf   :  { %s591_s0 = smov [#allocation10]  }
  0x10   :  { %s72_s26 = sshll.u32 %s591_s0, 4  ;;  %s73_s26 = int_to_ptr.vmem [resolvable:$true] %s72_s26 }
  0x11   :  { %78 = dma.hbm_to_vmem [thread:$0]  %s71_s25, 8192, %s73_s26, [#allocation9], %s587_s13, %s587_s13, %s588_s14  }
  0x12   :  { %575 = dma.done.wait [#allocation3], 128  }
  0x13   :  { %576 = vsyncadd [#allocation3], 4294967168 }
  0x14   :  { %577 = dma.done.wait [#allocation6], 2064  }
  0x15   :  { %578 = vsyncadd [#allocation6], 4294965232 }
  0x16   :  { %579 = dma.done.wait [#allocation9], 12288  }
  0x17   :  { %580 = vsyncadd [#allocation9], 4294955008  ;;  %v117_v0 = vld [vmem:[#allocation5 + $0x78] sm:$0xff]  ;;  %v116_v1 = vld [vmem:[#allocation5 + $0x70] sm:$0xff]  ;;  %s400_s9 = sshll.u32 %s671_s7, 4  ;;  %s401_s9 = int_to_ptr.hbm [resolvable:$true] %s400_s9 }
  0x18   :  { %122 = vmatpush.msra.mxu0 %v117_v0  ;;  %v115_v2 = vld [vmem:[#allocation5 + $0x68] sm:$0xff]  ;;  %v114_v3 = vld [vmem:[#allocation5 + $0x60] sm:$0xff]  ;;  %v113_v4 = vld [vmem:[#allocation5 + $0x58] sm:$0xff] }
  0x19   :  { %v173_v5 = vld [vmem:[#allocation8 + $0xf0] sm:$0xff]  ;;  %v174_v6 = vld [vmem:[#allocation8 + $0xf8] sm:$0xff]  ;;  %v171_v7 = vld [vmem:[#allocation8 + $0xe0] sm:$0xff] }
  0x1a   :  { %123 = vmatpush.msra.mxu0 %v116_v1  ;;  %181 = vmatpush.msra.mxu1 %v173_v5  ;;  %v172_v8 = vld [vmem:[#allocation8 + $0xe8] sm:$0xff]  ;;  %v169_v9 = vld [vmem:[#allocation8 + $0xd0] sm:$0xff]  ;;  %v170_v11 = vld [vmem:[#allocation8 + $0xd8] sm:$0xff] }
  0x1b   :  { %201 = vmatpush.msra.mxu2 %v174_v6  ;;  %v112_v10 = vld [vmem:[#allocation5 + $0x50] sm:$0xff]  ;;  %v167_v12 = vld [vmem:[#allocation8 + $0xc0] sm:$0xff]  ;;  %v166_v17 = vld [vmem:[#allocation8 + $0xb8] sm:$0xff] }
  0x1c   :  { %124 = vmatpush.msra.mxu0 %v115_v2  ;;  %182 = vmatpush.msra.mxu1 %v171_v7  ;;  %v111_v13 = vld [vmem:[#allocation5 + $0x48] sm:$0xff]  ;;  %v165_v15 = vld [vmem:[#allocation8 + $0xb0] sm:$0xff]  ;;  %v110_v16 = vld [vmem:[#allocation5 + $0x40] sm:$0xff] }
  0x1d   :  { %202 = vmatpush.msra.mxu2 %v172_v8  ;;  %v168_v14 = vld [vmem:[#allocation8 + $0xc8] sm:$0xff]  ;;  %v163_v18 = vld [vmem:[#allocation8 + $0xa0] sm:$0xff]  ;;  %v109_v19 = vld [vmem:[#allocation5 + $0x38] sm:$0xff] }
  0x1e   :  { %125 = vmatpush.msra.mxu0 %v114_v3  ;;  %183 = vmatpush.msra.mxu1 %v169_v9  ;;  %v164_v20 = vld [vmem:[#allocation8 + $0xa8] sm:$0xff]  ;;  %v161_v21 = vld [vmem:[#allocation8 + $0x90] sm:$0xff]  ;;  %v162_v23 = vld [vmem:[#allocation8 + $0x98] sm:$0xff] }
  0x1f   :  { %203 = vmatpush.msra.mxu2 %v170_v11  ;;  %v108_v22 = vld [vmem:[#allocation5 + $0x30] sm:$0xff]  ;;  %v159_v24 = vld [vmem:[#allocation8 + $0x80] sm:$0xff]  ;;  %v158_v29 = vld [vmem:[#allocation8 + $0x78] sm:$0xff] }
  0x20   :  { %126 = vmatpush.msra.mxu0 %v113_v4  ;;  %184 = vmatpush.msra.mxu1 %v167_v12  ;;  %v107_v25 = vld [vmem:[#allocation5 + $0x28] sm:$0xff]  ;;  %v157_v27 = vld [vmem:[#allocation8 + $0x70] sm:$0xff]  ;;  %v106_v28 = vld [vmem:[#allocation5 + $0x20] sm:$0xff] }
  0x21   :  { %204 = vmatpush.msra.mxu2 %v168_v14  ;;  %v160_v26 = vld [vmem:[#allocation8 + $0x88] sm:$0xff]  ;;  %v155_v30 = vld [vmem:[#allocation8 + $0x60] sm:$0xff]  ;;  %v105_v31 = vld [vmem:[#allocation5 + $0x18] sm:$0xff] }
  0x22   :  { %127 = vmatpush.msra.mxu0 %v112_v10  ;;  %185 = vmatpush.msra.mxu1 %v165_v15  ;;  %v156_v32 = vld [vmem:[#allocation8 + $0x68] sm:$0xff]  ;;  %v153_v33 = vld [vmem:[#allocation8 + $0x50] sm:$0xff]  ;;  %v154_v35 = vld [vmem:[#allocation8 + $0x58] sm:$0xff] }
  0x23   :  { %205 = vmatpush.msra.mxu2 %v166_v17  ;;  %v104_v34 = vld [vmem:[#allocation5 + $0x10] sm:$0xff]  ;;  %v151_v36 = vld [vmem:[#allocation8 + $0x40] sm:$0xff]  ;;  %v150_v41 = vld [vmem:[#allocation8 + $0x38] sm:$0xff] }
  0x24   :  { %128 = vmatpush.msra.mxu0 %v111_v13  ;;  %186 = vmatpush.msra.mxu1 %v163_v18  ;;  %v103_v37 = vld [vmem:[#allocation5 + $0x8] sm:$0xff]  ;;  %v149_v39 = vld [vmem:[#allocation8 + $0x30] sm:$0xff]  ;;  %v102_v40 = vld [vmem:[#allocation5] sm:$0xff] }
  0x25   :  { %206 = vmatpush.msra.mxu2 %v164_v20  ;;  %v152_v38 = vld [vmem:[#allocation8 + $0x48] sm:$0xff]  ;;  %v651_v42 = vld [vmem:[#allocation2] sm:$0xff]  ;;  %v147_v43 = vld [vmem:[#allocation8 + $0x20] sm:$0xff] }
  0x26   :  { %129 = vmatpush.msra.mxu0 %v110_v16  ;;  %187 = vmatpush.msra.mxu1 %v161_v21  ;;  %v148_v44 = vld [vmem:[#allocation8 + $0x28] sm:$0xff]  ;;  %v145_v45 = vld [vmem:[#allocation8 + $0x10] sm:$0xff]  ;;  %v146_v46 = vld [vmem:[#allocation8 + $0x18] sm:$0xff] }
  0x27   :  { %207 = vmatpush.msra.mxu2 %v162_v23  ;;  %v143_v47 = vld [vmem:[#allocation8] sm:$0xff]  ;;  %v144_v48 = vld [vmem:[#allocation8 + $0x8] sm:$0xff]  ;;  %v253_v49 = vld [vmem:[#allocation10 + $0xf0] sm:$0xff] }
  0x28   :  { %130 = vmatpush.msra.mxu0 %v109_v19  ;;  %188 = vmatpush.msra.mxu1 %v159_v24  ;;  %v254_v50 = vld [vmem:[#allocation10 + $0xf8] sm:$0xff]  ;;  %v251_v51 = vld [vmem:[#allocation10 + $0xe0] sm:$0xff]  ;;  %v252_v52 = vld [vmem:[#allocation10 + $0xe8] sm:$0xff] }
  0x29   :  { %208 = vmatpush.msra.mxu2 %v160_v26  ;;  %293 = vmatpush.msra.mxu3 %v253_v49  ;;  %v249_v53 = vld [vmem:[#allocation10 + $0xd0] sm:$0xff]  ;;  %v250_v54 = vld [vmem:[#allocation10 + $0xd8] sm:$0xff]  ;;  %v283_v57 = vld [vmem:[#allocation10 + $0x1e0] sm:$0xff] }
  0x2a   :  { %131 = vmatpush.msra.mxu0 %v108_v22  ;;  %189 = vmatpush.msra.mxu1 %v157_v27  ;;  %v285_v55 = vld [vmem:[#allocation10 + $0x1f0] sm:$0xff]  ;;  %v286_v56 = vld [vmem:[#allocation10 + $0x1f8] sm:$0xff]  ;;  %v247_v58 = vld [vmem:[#allocation10 + $0xc0] sm:$0xff] }
  0x2b   :  { %209 = vmatpush.msra.mxu2 %v158_v29  ;;  %294 = vmatpush.msra.mxu3 %v251_v51  ;;  %v248_v59 = vld [vmem:[#allocation10 + $0xc8] sm:$0xff]  ;;  %v281_v61 = vld [vmem:[#allocation10 + $0x1d0] sm:$0xff]  ;;  %v282_v62 = vld [vmem:[#allocation10 + $0x1d8] sm:$0xff] }
  0x2c   :  { %132 = vmatpush.msra.mxu0 %v107_v25  ;;  %190 = vmatpush.msra.mxu1 %v155_v30  ;;  %v284_v60 = vld [vmem:[#allocation10 + $0x1e8] sm:$0xff]  ;;  %v245_v63 = vld [vmem:[#allocation10 + $0xb0] sm:$0xff]  ;;  %v246_v0 = vld [vmem:[#allocation10 + $0xb8] sm:$0xff] }
  0x2d   :  { %210 = vmatpush.msra.mxu2 %v156_v32  ;;  %295 = vmatpush.msra.mxu3 %v249_v53  ;;  %v279_v1 = vld [vmem:[#allocation10 + $0x1c0] sm:$0xff]  ;;  %v280_v2 = vld [vmem:[#allocation10 + $0x1c8] sm:$0xff]  ;;  %v277_v5 = vld [vmem:[#allocation10 + $0x1b0] sm:$0xff] }
  0x2e   :  { %133 = vmatpush.msra.mxu0 %v106_v28  ;;  %191 = vmatpush.msra.mxu1 %v153_v33  ;;  %v243_v3 = vld [vmem:[#allocation10 + $0xa0] sm:$0xff]  ;;  %v244_v4 = vld [vmem:[#allocation10 + $0xa8] sm:$0xff]  ;;  %v278_v6 = vld [vmem:[#allocation10 + $0x1b8] sm:$0xff] }
  0x2f   :  { %211 = vmatpush.msra.mxu2 %v154_v35  ;;  %296 = vmatpush.msra.mxu3 %v247_v58  ;;  %v241_v7 = vld [vmem:[#allocation10 + $0x90] sm:$0xff]  ;;  %v242_v8 = vld [vmem:[#allocation10 + $0x98] sm:$0xff]  ;;  %v275_v9 = vld [vmem:[#allocation10 + $0x1a0] sm:$0xff] }
  0x30   :  { %134 = vmatpush.msra.mxu0 %v105_v31  ;;  %192 = vmatpush.msra.mxu1 %v151_v36  ;;  %v276_v10 = vld [vmem:[#allocation10 + $0x1a8] sm:$0xff]  ;;  %v239_v11 = vld [vmem:[#allocation10 + $0x80] sm:$0xff]  ;;  %v273_v13 = vld [vmem:[#allocation10 + $0x190] sm:$0xff] }
  0x31   :  { %212 = vmatpush.msra.mxu2 %v152_v38  ;;  %297 = vmatpush.msra.mxu3 %v245_v63  ;;  %v240_v12 = vld [vmem:[#allocation10 + $0x88] sm:$0xff]  ;;  %v274_v14 = vld [vmem:[#allocation10 + $0x198] sm:$0xff]  ;;  %v237_v15 = vld [vmem:[#allocation10 + $0x70] sm:$0xff]  ;;  %v592_v63 = vmov 2  }
  0x32   :  { %135 = vmatpush.msra.mxu0 %v104_v34  ;;  %193 = vmatpush.msra.mxu1 %v149_v39  ;;  %v238_v16 = vld [vmem:[#allocation10 + $0x78] sm:$0xff]  ;;  %v271_v17 = vld [vmem:[#allocation10 + $0x180] sm:$0xff]  ;;  %v272_v18 = vld [vmem:[#allocation10 + $0x188] sm:$0xff] }
  0x33   :  { %213 = vmatpush.msra.mxu2 %v150_v41  ;;  %298 = vmatpush.msra.mxu3 %v243_v3  ;;  %v235_v19 = vld [vmem:[#allocation10 + $0x60] sm:$0xff]  ;;  %v236_v20 = vld [vmem:[#allocation10 + $0x68] sm:$0xff]  ;;  %v269_v21 = vld [vmem:[#allocation10 + $0x170] sm:$0xff] }
  0x34   :  { %136 = vmatpush.msra.mxu0 %v103_v37  ;;  %194 = vmatpush.msra.mxu1 %v147_v43  ;;  %v270_v22 = vld [vmem:[#allocation10 + $0x178] sm:$0xff]  ;;  %v233_v23 = vld [vmem:[#allocation10 + $0x50] sm:$0xff]  ;;  %v267_v25 = vld [vmem:[#allocation10 + $0x160] sm:$0xff] }
  0x35   :  { %214 = vmatpush.msra.mxu2 %v148_v44  ;;  %299 = vmatpush.msra.mxu3 %v241_v7  ;;  %v234_v24 = vld [vmem:[#allocation10 + $0x58] sm:$0xff]  ;;  %v268_v26 = vld [vmem:[#allocation10 + $0x168] sm:$0xff]  ;;  %v231_v27 = vld [vmem:[#allocation10 + $0x40] sm:$0xff] }
  0x36   :  { %137 = vmatpush.msra.mxu0 %v102_v40  ;;  %195 = vmatpush.msra.mxu1 %v145_v45  ;;  %v232_v28 = vld [vmem:[#allocation10 + $0x48] sm:$0xff]  ;;  %v229_v29 = vld [vmem:[#allocation10 + $0x30] sm:$0xff]  ;;  %v230_v30 = vld [vmem:[#allocation10 + $0x38] sm:$0xff] }
  0x37   :  { %138 = vmatmul.f32.vlgmr.msra.gmra.mxu0 %v651_v42  ;;  %215 = vmatpush.msra.mxu2 %v146_v46  ;;  %v428_v31 = vld [vmem:[#allocation7] ss:$0 sm:$0xff]  ;;  %v227_v35 = vld [vmem:[#allocation10 + $0x20] sm:$0xff]  ;;  %v265_v36 = vld [vmem:[#allocation10 + $0x150] sm:$0xff] }
  0x38   :  { %196 = vmatpush.msra.mxu1 %v143_v47  ;;  %313 = vmatpush.msrb.mxu0 %v285_v55  ;;  %v228_v37 = vld [vmem:[#allocation10 + $0x28] sm:$0xff]  ;;  %v266_v38 = vld [vmem:[#allocation10 + $0x158] sm:$0xff]  ;;  %v225_v39 = vld [vmem:[#allocation10 + $0x10] sm:$0xff] }
  0x39   :  { %216 = vmatpush.msra.mxu2 %v144_v48  ;;  %300 = vmatpush.msra.mxu3 %v239_v11  ;;  %v263_v40 = vld [vmem:[#allocation10 + $0x140] sm:$0xff]  ;;  %v226_v41 = vld [vmem:[#allocation10 + $0x18] sm:$0xff]  ;;  %v264_v43 = vld [vmem:[#allocation10 + $0x148] sm:$0xff] }
  0x3a   :  { %333 = vmatpush.msrb.mxu1 %v254_v50  ;;  %314 = vmatpush.msrb.mxu0 %v283_v57  ;;  %v223_v44 = vld [vmem:[#allocation10] sm:$0xff]  ;;  %v261_v45 = vld [vmem:[#allocation10 + $0x130] sm:$0xff]  ;;  %v224_v46 = vld [vmem:[#allocation10 + $0x8] sm:$0xff] }
  0x3b   :  { %353 = vmatpush.msrb.mxu2 %v286_v56  ;;  %301 = vmatpush.msra.mxu3 %v237_v15  ;;  %v262_v47 = vld [vmem:[#allocation10 + $0x138] sm:$0xff]  ;;  %v259_v48 = vld [vmem:[#allocation10 + $0x120] sm:$0xff]  ;;  %v260_v49 = vld [vmem:[#allocation10 + $0x128] sm:$0xff] }
  0x3c   :  { %334 = vmatpush.msrb.mxu1 %v252_v52  ;;  %315 = vmatpush.msrb.mxu0 %v281_v61  ;;  %v257_v50 = vld [vmem:[#allocation10 + $0x110] sm:$0xff]  ;;  %v258_v51 = vld [vmem:[#allocation10 + $0x118] sm:$0xff]  ;;  %v255_v52 = vld [vmem:[#allocation10 + $0x100] sm:$0xff] }
  0x3d   :  { %354 = vmatpush.msrb.mxu2 %v284_v60  ;;  %302 = vmatpush.msra.mxu3 %v235_v19  ;;  %v256_v53 = vld [vmem:[#allocation10 + $0x108] sm:$0xff] }
  0x3e   :  { %335 = vmatpush.msrb.mxu1 %v250_v54  ;;  %316 = vmatpush.msrb.mxu0 %v279_v1  ;;  %v175_v54 = vld [vmem:[%s668_s4] sm:$0x3]  ;;  %s593_s4 = smov 127  }
  0x3f   :  { %355 = vmatpush.msrb.mxu2 %v282_v62  ;;  %303 = vmatpush.msra.mxu3 %v233_v23  ;;  %v177_v55 = vperm.slane %v175_v54, 0 }
  0x40   :  { %336 = vmatpush.msrb.mxu1 %v248_v59  ;;  %317 = vmatpush.msrb.mxu0 %v277_v5  ;;  %v178_v59 = vperm.slane %v175_v54, 1 }
  0x41   :  { %356 = vmatpush.msrb.mxu2 %v280_v2  ;;  %304 = vmatpush.msra.mxu3 %v231_v27 }
  0x42   :  { %337 = vmatpush.msrb.mxu1 %v246_v0  ;;  %318 = vmatpush.msrb.mxu0 %v275_v9  ;;  %v287_v0 = vld [vmem:[%s670_s6] sm:$0x3]  ;;  %s595_s6 = smov [#allocation11]  }
  0x43   :  { %357 = vmatpush.msrb.mxu2 %v278_v6  ;;  %305 = vmatpush.msra.mxu3 %v229_v29  ;;  %v289_v1 = vperm.slane %v287_v0, 0  ;;  %v290_v11 = vperm.slane %v287_v0, 1  ;;  %s398_s29 = sshll.u32 %s595_s6, 4  ;;  %s399_s29 = int_to_ptr.vmem [resolvable:$true] %s398_s29 }
  0x44   :  { %338 = vmatpush.msrb.mxu1 %v244_v4  ;;  %319 = vmatpush.msrb.mxu0 %v273_v13 }
  0x45   :  { %358 = vmatpush.msrb.mxu2 %v276_v10  ;;  %306 = vmatpush.msra.mxu3 %v227_v35 }
  0x46   :  { %339 = vmatpush.msrb.mxu1 %v242_v8  ;;  %320 = vmatpush.msrb.mxu0 %v271_v17  ;;  %v594_v8 = vmov 0  }
  0x47   :  { %359 = vmatpush.msrb.mxu2 %v274_v14  ;;  %307 = vmatpush.msra.mxu3 %v225_v39 }
  0x48   :  { %340 = vmatpush.msrb.mxu1 %v240_v12  ;;  %321 = vmatpush.msrb.mxu0 %v269_v21 }
  0x49   :  { %360 = vmatpush.msrb.mxu2 %v272_v18  ;;  %308 = vmatpush.msra.mxu3 %v223_v44 }
  0x4a   :  { %341 = vmatpush.msrb.mxu1 %v238_v16  ;;  %322 = vmatpush.msrb.mxu0 %v267_v25 }
  0x4b   :  { %361 = vmatpush.msrb.mxu2 %v270_v22  ;;  %426 = vset.pattern.permute.xlu1 %v592_v63 }
  0x4c   :  { %342 = vmatpush.msrb.mxu1 %v236_v20  ;;  %323 = vmatpush.msrb.mxu0 %v265_v36 }
  0x4d   :  { %362 = vmatpush.msrb.mxu2 %v268_v26  ;;  %425 = vset.pattern.permute.xlu0 %v594_v8 }
  0x4e   :  { %343 = vmatpush.msrb.mxu1 %v234_v24  ;;  %324 = vmatpush.msrb.mxu0 %v263_v40 }
  0x4f   :  { %363 = vmatpush.msrb.mxu2 %v266_v38 }
  0x50   :  { %344 = vmatpush.msrb.mxu1 %v232_v28  ;;  %325 = vmatpush.msrb.mxu0 %v261_v45 }
  0x51   :  { %364 = vmatpush.msrb.mxu2 %v264_v43 }
  0x52   :  { %345 = vmatpush.msrb.mxu1 %v230_v30  ;;  %326 = vmatpush.msrb.mxu0 %v259_v48 }
  0x53   :  { %365 = vmatpush.msrb.mxu2 %v262_v47 }
  0x54   :  { %346 = vmatpush.msrb.mxu1 %v228_v37  ;;  %327 = vmatpush.msrb.mxu0 %v257_v50 }
  0x55   :  { %366 = vmatpush.msrb.mxu2 %v260_v49 }
  0x56   :  { %347 = vmatpush.msrb.mxu1 %v226_v41  ;;  %328 = vmatpush.msrb.mxu0 %v255_v52 }
  0x57   :  { %367 = vmatpush.msrb.mxu2 %v258_v51 }
  0x58   :  { %348 = vmatpush.msrb.mxu1 %v224_v46 }
  0x59   :  { %368 = vmatpush.msrb.mxu2 %v256_v53 }
  0xb4   :  { %v139_v32 = vpop.f32.mrf.mxu0 }
  0xb5   :  { %v140_v33 = vadd.f32 %v428_v31, %v139_v32 }
  0xb7   :  { %v142_v34 = vmax.f32 %v140_v33, 0.0 }
  0xb9   :  { %197 = vmatmul.f32.vlgmr.msra.gmra.mxu1 %v142_v34  ;;  %217 = vmatmul.f32.vlgmr.msra.gmra.mxu2 %v142_v34 }
 0x136   :  { %v198_v56 = vpop.f32.mrf.mxu1 }
 0x137   :  { %v199_v57 = vadd.f32 %v198_v56, %v177_v55 }
 0x139   :  { %v221_v58 = vmax.f32 %v199_v57, 0.0 }
 0x13b   :  { %309 = vmatmul.f32.vlgmr.msra.gmra.mxu3 %v221_v58  ;;  %349 = vmatmul.f32.vlgmr.msrb.gmra.mxu1 %v221_v58 }
 0x13c   :  { %v218_v60 = vpop.f32.mrf.mxu2 }
 0x13d   :  { %v219_v61 = vadd.f32 %v218_v60, %v178_v59 }
 0x13f   :  { %v222_v62 = vmax.f32 %v219_v61, 0.0 }
 0x141   :  { %329 = vmatmul.f32.vlgmr.msrb.gmra.mxu0 %v222_v62  ;;  %369 = vmatmul.f32.vlgmr.msrb.gmra.mxu2 %v222_v62 }
 0x1b8   :  { %v350_v12 = vpop.f32.mrf.mxu1 }
 0x1b9   :  { %v351_v14 = vadd.f32 %v350_v12, %v290_v11 }
 0x1be   :  { %v310_v2 = vpop.f32.mrf.mxu3  ;;  %v330_v4 = vpop.f32.mrf.mxu0 }
 0x1bf   :  { %v311_v3 = vadd.f32 %v310_v2, %v289_v1 }
 0x1c1   :  { %v331_v5 = vadd.f32 %v330_v4, %v311_v3 }
 0x1c3   :  { %v373_v6 = vmul.f32 1.442695, %v331_v5 }
 0x1c4   :  { %v370_v13 = vpop.f32.mrf.mxu2 }
 0x1c5   :  { %429 = vpow2.f32 %v373_v6  ;;  %v371_v16 = vadd.f32 %v370_v13, %v351_v14 }
 0x1cb   :  { %v430_v7 = vpop.eup %429 }
 0x1cc   :  { %388 = vperm.xlu1 %426, %v430_v7   ;;  %376 = vrot.lane.b32.xlu0 %v430_v7, %s593_s4 }
 0x23e   :  { %v377_v9 = vpop.permute.xlu0 %376  ;;  %v389_v19 = vpop.permute.xlu1 %388 }
 0x23f   :  { %v379_v10 = vadd.f32 %v430_v7, %v377_v9 }
 0x241   :  { %382 = vperm.xlu0 %425, %v379_v10  }
 0x249   :  { %427 = vset.pattern.permute.xlu0 %v592_v63 }
 0x2b3   :  { %v383_v15 = vpop.permute.xlu0 %382 }
 0x2b4   :  { %v385_v17 = vmul.f32 %v383_v15, %v651_v42 }
 0x2b6   :  { %v386_v18 = vsub.f32 %v371_v16, %v385_v17 }
 0x2b8   :  { %v391_v20 = vmul.f32 %v389_v19, %v386_v18 }
 0x2ba   :  { %392 = vst [vmem:[#allocation11] sm:$0xff] %v391_v20 }
 0x2bb   :  { %403 = dma.vmem_to_hbm [thread:$0]  %s399_s29, 128, %s401_s9, [#allocation4]  }
 0x2bc   :  { %581 = dma.done.wait [#allocation4], 128  }
 0x2bd   :  { %582 = vsyncadd [#allocation4], 4294967168 }
 0x2be   :  { %408 = vsyncpa [#allocation3], 1 }
 0x2bf   :  { %409 = vsyncpa [#allocation6], 1 }
 0x2c0   :  { %410 = vsyncpa [#allocation9], 1 }
 0x2c1   :  { %411 = vsyncpa [#allocation4], 1 }

</bundles_post_ra>
